<compile_context>
chip_gen: v5e
topology: v5e:2x2
jax: 0.10.0
libtpu: 0.0.40
codegen_flags: <defaults>
</compile_context>

<pallas_src>
import math
import jax
import jax.numpy as jnp
from jax import lax
from jax.experimental import pallas as pl
from jax.experimental.pallas import tpu as pltpu


def _round_up(n, m):
    return ((n + m - 1) // m) * m


def _cdiv(a, b):
    return -(-a // b)


def _pad2d(a, rows, cols):
    return jnp.pad(a, ((0, rows - a.shape[0]), (0, cols - a.shape[1])))


# "NT" contraction (contract last dim of both operands) -> MXU q@k^T pattern.
_NT_DIMS = (((1,), (1,)), ((), ()))


def mlp_kernel(x_ref,
               w1_ref, b1_ref,
               w2_ref, b2_ref,
               w3_ref, b3_ref,
               w4_ref, b4_ref,
               w5t_ref, b5_ref,
               out_ref):
    """One tile_b-row slab of the fused forward pass. Weights/biases stay
    VMEM-resident (constant index_map); x and out tiles are double-buffered."""
    cdt = w1_ref.dtype  # MXU input dtype (f32, or bf16 with f32 accumulation)

    # Hidden layers: Linear + ReLU.  MXU accumulates in f32; bias-add / ReLU
    # stay in f32 (v5e VPU has no bf16 path).  Zero-padded lanes stay exactly
    # zero through every layer, so padding never changes the result.
    z = jnp.dot(x_ref[...].astype(cdt), w1_ref[...],
                preferred_element_type=jnp.float32) + b1_ref[...]
    z = jnp.maximum(z, 0.0)
    z = jnp.dot(z.astype(cdt), w2_ref[...],
                preferred_element_type=jnp.float32) + b2_ref[...]
    z = jnp.maximum(z, 0.0)
    z = jnp.dot(z.astype(cdt), w3_ref[...],
                preferred_element_type=jnp.float32) + b3_ref[...]
    z = jnp.maximum(z, 0.0)
    z = jnp.dot(z.astype(cdt), w4_ref[...],
                preferred_element_type=jnp.float32) + b4_ref[...]
    z = jnp.maximum(z, 0.0)                                  # (tile_b, h4_pad)

    # Output layer (real width 1), computed directly in lane-packed
    # orientation:  r[p, b] = sum_k W5t[p, k] * z[b, k].
    # Row 0 of r is the real output column; rows 1..7 are zero padding.
    r = lax.dot_general(w5t_ref[...], z.astype(cdt), _NT_DIMS,
                        preferred_element_type=jnp.float32)   # (8, tile_b)
    row = r[0:1, :] + b5_ref[0]                               # (1, tile_b)
    out_ref[...] = row[None, :, :]                            # (1, 1, tile_b)


def prepare_params(params, compute_dtype=jnp.float32):
    """One-time layout prep, hoisted out of the per-call forward:
      * hidden weights zero-padded to multiples of 128 on the output side and
        to the previous layer's padded width on the input side,
      * W1 keeps its true (small) input width, rounded up only to 8,
      * the output layer is stored transposed as (8, h4_pad), row 0 real,
      * biases stay f32; matmul inputs are cast to `compute_dtype`.
    Zero padding keeps the f32 path bit-identical to the unpadded forward."""
    (w1, b1), (w2, b2), (w3, b3), (w4, b4), (w5, b5) = params
    in_pad = max(8, _round_up(w1.shape[0], 8))
    h_pads = [max(128, _round_up(w.shape[1], 128)) for w in (w1, w2, w3, w4)]

    ws, bs = [], []
    prev = in_pad
    for (w, b), hp in zip([(w1, b1), (w2, b2), (w3, b3), (w4, b4)], h_pads):
        ws.append(_pad2d(w, prev, hp).astype(compute_dtype))
        bs.append(_pad2d(jnp.asarray(b).reshape(1, -1), 1, hp).astype(jnp.float32))
        prev = hp

    w5t = _pad2d(jnp.asarray(w5).T, 8, h_pads[-1]).astype(compute_dtype)
    b5s = jnp.asarray(b5).reshape(-1)[:1].astype(jnp.float32)   # (1,) SMEM scalar
    return {"ws": tuple(ws), "bs": tuple(bs), "w5t": w5t, "b5": b5s}


def _choose_tile_b(B, max_tile_b):
    if B <= 128:
        return _round_up(max(B, 1), 8)          # one small tile
    tile = max(128, min(max_tile_b, _round_up(B, 128)))
    # Keep >=2 grid steps so the "parallel" batch axis can split across both
    # TensorCores on v7x (harmless on single-TC v5e/v6e).
    if _cdiv(B, tile) < 2:
        tile = max(128, _round_up(_cdiv(B, 2), 128))
    return tile


def net_forward(x, prepped, max_tile_b=2048):
    """x: (B, inputSize). Returns (B, 1) f32 — same semantics as the PyTorch
    Net forward (4x Linear+ReLU, then Linear to 1 output)."""
    B = x.shape[0]
    ws, bs = prepped["ws"], prepped["bs"]
    w5t, b5 = prepped["w5t"], prepped["b5"]
    in_pad = ws[0].shape[0]

    # Only pad the (tiny) feature dim if inputSize is not a multiple of 8;
    # no 128-lane whole-batch pad pass anymore.
    if x.shape[1] != in_pad:
        x = jnp.pad(x, ((0, 0), (0, in_pad - x.shape[1])))

    tile_b = _choose_tile_b(B, max_tile_b)
    if x.shape[0] < tile_b:                     # only possible for small B
        x = jnp.pad(x, ((0, tile_b - x.shape[0]), (0, 0)))
    num_tiles = _cdiv(B, tile_b)                # last block may be partial

    in_specs = [pl.BlockSpec((tile_b, in_pad), lambda i: (i, 0))]
    args = [x]
    for w, b in zip(ws, bs):
        args += [w, b]
        # Constant index_map -> weights/biases stay resident in VMEM.
        in_specs += [pl.BlockSpec(w.shape, lambda i: (0, 0)),
                     pl.BlockSpec(b.shape, lambda i: (0, 0))]
    args += [w5t, b5]
    in_specs += [pl.BlockSpec(w5t.shape, lambda i: (0, 0)),
                 pl.BlockSpec(memory_space=pltpu.MemorySpace.SMEM)]

    # Advisory cost estimate: real (de-padded) IO bytes, padded matmul flops.
    flops = 2 * B * (sum(int(w.shape[0]) * int(w.shape[1]) for w in ws)
                     + int(w5t.shape[0]) * int(w5t.shape[1]))
    bytes_accessed = (B * int(x.shape[1]) * x.dtype.itemsize
                      + num_tiles * tile_b * 4
                      + sum(int(a.size) * a.dtype.itemsize
                            for a in (*ws, *bs, w5t, b5)))

    out = pl.pallas_call(
        mlp_kernel,
        out_shape=jax.ShapeDtypeStruct((num_tiles, 1, tile_b), jnp.float32),
        grid=(num_tiles,),
        in_specs=in_specs,
        out_specs=pl.BlockSpec((1, 1, tile_b), lambda i: (i, 0, 0)),
        compiler_params=pltpu.CompilerParams(
            dimension_semantics=("parallel",)),
        cost_estimate=pl.CostEstimate(flops=int(flops), transcendentals=0,
                                      bytes_accessed=int(bytes_accessed)),
    )(*args)

    # Lane-packed (num_tiles, 1, tile_b) -> (B, 1); rows >= B are scratch.
    return out.reshape(-1)[:B].reshape(B, 1)


def xavier_uniform(key, fan_in, fan_out):
    """Matches torch.nn.init.xavier_uniform_ (gain=1), stored as (in, out)."""
    limit = math.sqrt(6.0 / (fan_in + fan_out))
    return jax.random.uniform(key, (fan_in, fan_out), jnp.float32, -limit, limit)


def init_params(key, input_size, h1, h2, h3, h4):
    sizes = [(input_size, h1), (h1, h2), (h2, h3), (h3, h4), (h4, 1)]
    params = []
    keys = jax.random.split(key, len(sizes))
    for k, (fi, fo) in zip(keys, sizes):
        w = xavier_uniform(k, fi, fo)
        b = jnp.zeros((1, fo), jnp.float32)     # zeros_ init for all biases
        params.append((w, b))
    return params


def reference_forward(x, params):
    z = x
    for i, (w, b) in enumerate(params):
        z = jnp.dot(z, w) + b
        if i < len(params) - 1:
            z = jnp.maximum(z, 0.0)
    return z


if __name__ == "__main__":
    # Small shapes consistent with the module: inputSize=16, hidden1..4=32,
    # output=1. Batch=256 -> tile_b=128, 2 grid steps (exercises the batch
    # grid and the v7x two-step rule).
    B, IN, H1, H2, H3, H4 = 256, 16, 32, 32, 32, 32

    key = jax.random.PRNGKey(0)
    kx, kp = jax.random.split(key)
    x = jax.random.normal(kx, (B, IN), jnp.float32)
    params = init_params(kp, IN, H1, H2, H3, H4)
    ref = reference_forward(x, params)

    fwd = jax.jit(net_forward, static_argnames=("max_tile_b",))

    # f32 path: exact (zero padding preserves the unpadded forward).
    prepped_f32 = prepare_params(params, jnp.float32)
    out = jax.block_until_ready(fwd(x, prepped_f32, max_tile_b=2048))
    assert out.shape == (B, 1)
    assert jnp.allclose(out, ref, atol=1e-5, rtol=1e-5)

    # bf16 matmul inputs / f32 accumulation (v6e/v7x MXU lever): sanity check
    # with a loose tolerance (intentionally not bit-identical).
    prepped_bf16 = prepare_params(params, jnp.bfloat16)
    out_bf16 = jax.block_until_ready(fwd(x, prepped_bf16, max_tile_b=2048))
    assert out_bf16.shape == (B, 1)
    assert jnp.allclose(out_bf16, ref, atol=1e-1, rtol=1e-1)

    print("KERNEL_OK")
</pallas_src>

<mosaic_0001>
module attributes {stable_mosaic.version = 11 : i64} {
  func.func @mlp_kernel(%arg0: i32, %arg1: memref<128x16xf32, #tpu.memory_space<vmem>>, %arg2: memref<16x128xf32, #tpu.memory_space<vmem>>, %arg3: memref<1x128xf32, #tpu.memory_space<vmem>>, %arg4: memref<128x128xf32, #tpu.memory_space<vmem>>, %arg5: memref<1x128xf32, #tpu.memory_space<vmem>>, %arg6: memref<128x128xf32, #tpu.memory_space<vmem>>, %arg7: memref<1x128xf32, #tpu.memory_space<vmem>>, %arg8: memref<128x128xf32, #tpu.memory_space<vmem>>, %arg9: memref<1x128xf32, #tpu.memory_space<vmem>>, %arg10: memref<8x128xf32, #tpu.memory_space<vmem>>, %arg11: memref<1xf32, #tpu.memory_space<smem>>, %arg12: memref<1x1x128xf32, #tpu.memory_space<vmem>>) attributes {dimension_semantics = [#tpu.dimension_semantics<parallel>], iteration_bounds = array<i64: 2>, scalar_prefetch = 0 : i64, scratch_operands = 0 : i64, tpu.core_type = #tpu.core_type<tc>, window_params = [{transform_indices = @transform_0, window_bounds = array<i64: 128, 16>}, {pipeline_mode = #tpu.pipeline_mode<synchronous>, transform_indices = @transform_1, window_bounds = array<i64: 16, 128>}, {pipeline_mode = #tpu.pipeline_mode<synchronous>, transform_indices = @transform_2, window_bounds = array<i64: 1, 128>}, {pipeline_mode = #tpu.pipeline_mode<synchronous>, transform_indices = @transform_3, window_bounds = array<i64: 128, 128>}, {pipeline_mode = #tpu.pipeline_mode<synchronous>, transform_indices = @transform_4, window_bounds = array<i64: 1, 128>}, {pipeline_mode = #tpu.pipeline_mode<synchronous>, transform_indices = @transform_5, window_bounds = array<i64: 128, 128>}, {pipeline_mode = #tpu.pipeline_mode<synchronous>, transform_indices = @transform_6, window_bounds = array<i64: 1, 128>}, {pipeline_mode = #tpu.pipeline_mode<synchronous>, transform_indices = @transform_7, window_bounds = array<i64: 128, 128>}, {pipeline_mode = #tpu.pipeline_mode<synchronous>, transform_indices = @transform_8, window_bounds = array<i64: 1, 128>}, {pipeline_mode = #tpu.pipeline_mode<synchronous>, transform_indices = @transform_9, window_bounds = array<i64: 8, 128>}, {transform_indices = @transform_10, window_bounds = array<i64: 1>}, {transform_indices = @transform_11, window_bounds = array<i64: 1, 1, 128>}]} {
    %c0 = arith.constant 0 : index
    %c0_0 = arith.constant 0 : index
    %0 = vector.load %arg1[%c0, %c0_0] : memref<128x16xf32, #tpu.memory_space<vmem>>, vector<128x16xf32>
    %c0_1 = arith.constant 0 : index
    %c0_2 = arith.constant 0 : index
    %1 = vector.load %arg2[%c0_1, %c0_2] : memref<16x128xf32, #tpu.memory_space<vmem>>, vector<16x128xf32>
    %cst = arith.constant dense<0.000000e+00> : vector<128x128xf32>
    %2 = tpu.matmul %0, %1, %cst {dimension_numbers = #tpu.dot_dimension_numbers<[1], [0], [0], [1], [0, 0, 1, 1], [], []>} : vector<128x16xf32>, vector<16x128xf32>, vector<128x128xf32> -> vector<128x128xf32>
    %c0_3 = arith.constant 0 : index
    %c0_4 = arith.constant 0 : index
    %3 = vector.load %arg3[%c0_3, %c0_4] : memref<1x128xf32, #tpu.memory_space<vmem>>, vector<1x128xf32>
    %4 = vector.broadcast %3 : vector<1x128xf32> to vector<128x128xf32>
    %5 = arith.addf %2, %4 : vector<128x128xf32>
    %cst_5 = arith.constant 0.000000e+00 : f32
    %6 = vector.broadcast %cst_5 : f32 to vector<128x128xf32>
    %7 = arith.maximumf %5, %6 : vector<128x128xf32>
    %c0_6 = arith.constant 0 : index
    %c0_7 = arith.constant 0 : index
    %8 = vector.load %arg4[%c0_6, %c0_7] : memref<128x128xf32, #tpu.memory_space<vmem>>, vector<128x128xf32>
    %cst_8 = arith.constant dense<0.000000e+00> : vector<128x128xf32>
    %9 = tpu.matmul %7, %8, %cst_8 {dimension_numbers = #tpu.dot_dimension_numbers<[1], [0], [0], [1], [0, 0, 1, 1], [], []>} : vector<128x128xf32>, vector<128x128xf32>, vector<128x128xf32> -> vector<128x128xf32>
    %c0_9 = arith.constant 0 : index
    %c0_10 = arith.constant 0 : index
    %10 = vector.load %arg5[%c0_9, %c0_10] : memref<1x128xf32, #tpu.memory_space<vmem>>, vector<1x128xf32>
    %11 = vector.broadcast %10 : vector<1x128xf32> to vector<128x128xf32>
    %12 = arith.addf %9, %11 : vector<128x128xf32>
    %cst_11 = arith.constant 0.000000e+00 : f32
    %13 = vector.broadcast %cst_11 : f32 to vector<128x128xf32>
    %14 = arith.maximumf %12, %13 : vector<128x128xf32>
    %c0_12 = arith.constant 0 : index
    %c0_13 = arith.constant 0 : index
    %15 = vector.load %arg6[%c0_12, %c0_13] : memref<128x128xf32, #tpu.memory_space<vmem>>, vector<128x128xf32>
    %cst_14 = arith.constant dense<0.000000e+00> : vector<128x128xf32>
    %16 = tpu.matmul %14, %15, %cst_14 {dimension_numbers = #tpu.dot_dimension_numbers<[1], [0], [0], [1], [0, 0, 1, 1], [], []>} : vector<128x128xf32>, vector<128x128xf32>, vector<128x128xf32> -> vector<128x128xf32>
    %c0_15 = arith.constant 0 : index
    %c0_16 = arith.constant 0 : index
    %17 = vector.load %arg7[%c0_15, %c0_16] : memref<1x128xf32, #tpu.memory_space<vmem>>, vector<1x128xf32>
    %18 = vector.broadcast %17 : vector<1x128xf32> to vector<128x128xf32>
    %19 = arith.addf %16, %18 : vector<128x128xf32>
    %cst_17 = arith.constant 0.000000e+00 : f32
    %20 = vector.broadcast %cst_17 : f32 to vector<128x128xf32>
    %21 = arith.maximumf %19, %20 : vector<128x128xf32>
    %c0_18 = arith.constant 0 : index
    %c0_19 = arith.constant 0 : index
    %22 = vector.load %arg8[%c0_18, %c0_19] : memref<128x128xf32, #tpu.memory_space<vmem>>, vector<128x128xf32>
    %cst_20 = arith.constant dense<0.000000e+00> : vector<128x128xf32>
    %23 = tpu.matmul %21, %22, %cst_20 {dimension_numbers = #tpu.dot_dimension_numbers<[1], [0], [0], [1], [0, 0, 1, 1], [], []>} : vector<128x128xf32>, vector<128x128xf32>, vector<128x128xf32> -> vector<128x128xf32>
    %c0_21 = arith.constant 0 : index
    %c0_22 = arith.constant 0 : index
    %24 = vector.load %arg9[%c0_21, %c0_22] : memref<1x128xf32, #tpu.memory_space<vmem>>, vector<1x128xf32>
    %25 = vector.broadcast %24 : vector<1x128xf32> to vector<128x128xf32>
    %26 = arith.addf %23, %25 : vector<128x128xf32>
    %cst_23 = arith.constant 0.000000e+00 : f32
    %27 = vector.broadcast %cst_23 : f32 to vector<128x128xf32>
    %28 = arith.maximumf %26, %27 : vector<128x128xf32>
    %c0_24 = arith.constant 0 : index
    %c0_25 = arith.constant 0 : index
    %29 = vector.load %arg10[%c0_24, %c0_25] : memref<8x128xf32, #tpu.memory_space<vmem>>, vector<8x128xf32>
    %cst_26 = arith.constant dense<0.000000e+00> : vector<8x128xf32>
    %30 = tpu.matmul %29, %28, %cst_26 {dimension_numbers = #tpu.dot_dimension_numbers<[1], [1], [0], [0], [0, 0, 1, 0], [], []>} : vector<8x128xf32>, vector<128x128xf32>, vector<8x128xf32> -> vector<8x128xf32>
    %31 = vector.extract_strided_slice %30 {offsets = [0, 0], sizes = [1, 128], strides = [1, 1]} : vector<8x128xf32> to vector<1x128xf32>
    %c0_27 = arith.constant 0 : index
    %32 = memref.load %arg11[%c0_27] : memref<1xf32, #tpu.memory_space<smem>>
    %33 = vector.broadcast %32 : f32 to vector<1x128xf32>
    %34 = arith.addf %31, %33 : vector<1x128xf32>
    %35 = vector.shape_cast %34 : vector<1x128xf32> to vector<1x1x128xf32>
    %c0_28 = arith.constant 0 : index
    %c0_29 = arith.constant 0 : index
    %c0_30 = arith.constant 0 : index
    %36 = vector.load %arg12[%c0_28, %c0_29, %c0_30] : memref<1x1x128xf32, #tpu.memory_space<vmem>>, vector<1x1x128xf32>
    tpu.vector_store %arg12[%c0_28, %c0_29, %c0_30], %35 {strides = array<i32>} : memref<1x1x128xf32, #tpu.memory_space<vmem>>, vector<1x1x128xf32>,
    return
  }
  func.func @transform_0(%arg0: i32) -> (i32, i32) {
    %c0_i32 = arith.constant 0 : i32
    %c0_i32_0 = arith.constant 0 : i32
    return %arg0, %c0_i32 : i32, i32
  }
  func.func @transform_1(%arg0: i32) -> (i32, i32) {
    %c0_i32 = arith.constant 0 : i32
    %c0_i32_0 = arith.constant 0 : i32
    %c0_i32_1 = arith.constant 0 : i32
    return %c0_i32, %c0_i32_0 : i32, i32
  }
  func.func @transform_2(%arg0: i32) -> (i32, i32) {
    %c0_i32 = arith.constant 0 : i32
    %c0_i32_0 = arith.constant 0 : i32
    %c0_i32_1 = arith.constant 0 : i32
    return %c0_i32, %c0_i32_0 : i32, i32
  }
  func.func @transform_3(%arg0: i32) -> (i32, i32) {
    %c0_i32 = arith.constant 0 : i32
    %c0_i32_0 = arith.constant 0 : i32
    %c0_i32_1 = arith.constant 0 : i32
    return %c0_i32, %c0_i32_0 : i32, i32
  }
  func.func @transform_4(%arg0: i32) -> (i32, i32) {
    %c0_i32 = arith.constant 0 : i32
    %c0_i32_0 = arith.constant 0 : i32
    %c0_i32_1 = arith.constant 0 : i32
    return %c0_i32, %c0_i32_0 : i32, i32
  }
  func.func @transform_5(%arg0: i32) -> (i32, i32) {
    %c0_i32 = arith.constant 0 : i32
    %c0_i32_0 = arith.constant 0 : i32
    %c0_i32_1 = arith.constant 0 : i32
    return %c0_i32, %c0_i32_0 : i32, i32
  }
  func.func @transform_6(%arg0: i32) -> (i32, i32) {
    %c0_i32 = arith.constant 0 : i32
    %c0_i32_0 = arith.constant 0 : i32
    %c0_i32_1 = arith.constant 0 : i32
    return %c0_i32, %c0_i32_0 : i32, i32
  }
  func.func @transform_7(%arg0: i32) -> (i32, i32) {
    %c0_i32 = arith.constant 0 : i32
    %c0_i32_0 = arith.constant 0 : i32
    %c0_i32_1 = arith.constant 0 : i32
    return %c0_i32, %c0_i32_0 : i32, i32
  }
  func.func @transform_8(%arg0: i32) -> (i32, i32) {
    %c0_i32 = arith.constant 0 : i32
    %c0_i32_0 = arith.constant 0 : i32
    %c0_i32_1 = arith.constant 0 : i32
    return %c0_i32, %c0_i32_0 : i32, i32
  }
  func.func @transform_9(%arg0: i32) -> (i32, i32) {
    %c0_i32 = arith.constant 0 : i32
    %c0_i32_0 = arith.constant 0 : i32
    %c0_i32_1 = arith.constant 0 : i32
    return %c0_i32, %c0_i32_0 : i32, i32
  }
  func.func @transform_10(%arg0: i32) -> i32 {
    %c0_i32 = arith.constant 0 : i32
    %c0_i32_0 = arith.constant 0 : i32
    return %c0_i32 : i32
  }
  func.func @transform_11(%arg0: i32) -> (i32, i32, i32) {
    %c0_i32 = arith.constant 0 : i32
    %c0_i32_0 = arith.constant 0 : i32
    %c0_i32_1 = arith.constant 0 : i32
    return %arg0, %c0_i32, %c0_i32_0 : i32, i32, i32
  }
}

</mosaic_0001>

<bundles_post_ra>
// kernel: net_forward.1
= control target key start
LH: loop header
LB: loop body
LE: loop exit
PB: predicated region body
PF: predicated region fallthrough
CT: control target
= control target key end

     0   :  { %s1491_s0 = inlined_call_operand.vmem [shape: f32[256,16], index: 0, kind: input, shape index: {}]   ;;  %s1492_s1 = inlined_call_operand.vmem [shape: f32[16,128], index: 1, kind: input, shape index: {}]   ;;  %s1493_s2 = inlined_call_operand.vmem [shape: f32[1,128], index: 2, kind: input, shape index: {}]   ;;  %s1494_s3 = inlined_call_operand.vmem [shape: f32[128,128], index: 3, kind: input, shape index: {}]   ;;  %s1495_s4 = inlined_call_operand.vmem [shape: f32[1,128], index: 4, kind: input, shape index: {}]   ;;  %s1496_s5 = inlined_call_operand.vmem [shape: f32[128,128], index: 5, kind: input, shape index: {}]   ;;  %s1497_s6 = inlined_call_operand.vmem [shape: f32[1,128], index: 6, kind: input, shape index: {}]   ;;  %s1498_s7 = inlined_call_operand.hbm [shape: f32[128,128], index: 7, kind: input, shape index: {}]   ;;  %s1499_s8 = inlined_call_operand.vmem [shape: f32[1,128], index: 8, kind: input, shape index: {}]   ;;  %s1500_s9 = inlined_call_operand.vmem [shape: f32[8,128], index: 9, kind: input, shape index: {}]   ;;  %s1501_s10 = inlined_call_operand.<no memory space> [shape: f32[1], index: 10, kind: input, shape index: {}]   ;;  %s1502_s11 = inlined_call_operand.hbm [shape: f32[2,1,128], index: 11, kind: output, shape index: {}]  }
   0x1   :  { %1503 = sst [smem:[#allocation9_spill]] %s1491_s0 }
   0x2   :  { %16 = sst [smem:[#allocation2]] %s1501_s10 }
   0x3   :  { %17 = vsyncpa [#allocation4], 0 }
   0x4   :  { %18 = vsyncpa [#allocation5], 0 }
   0x5   :  { %20 = vsyncpa [#allocation5 + $0x1], 0  ;;  %s1210_s19 = smov 0   ;;  %s1212_s20 = smov 0  }
   0x6   :  { %s1214_s21 = smov 0   ;;  %s1216_s22 = smov 0  }
   0x7 LB: > { %s1231_s10 = sadd.s32 4294967295, %s1142_s22   ;;  %s964_s23 = sadd.s32 4294967294, %s1142_s22   ;;  %s1142_s22 = sphi %s1216_s22, %s1510_s22   ;;  %s1138_s21 = sphi %s1214_s21, %s1509_s21   ;;  %s1134_s20 = sphi %s1212_s20, %s1508_s20   ;;  %s1130_s19 = sphi %s1210_s19, %s1507_s19  }
   0x8   : > { %s1235_s24 = sadd.s32 1, %s1142_s22   ;;  %s269_s25 = sadd.s32 1, %s1138_s21 }
   0x9   : > { %s266_s26 = ssub.s32 %s1142_s22, %s1235_s24  ;;  %p279_p0 = scmp.ne.s32.totalorder %s1138_s21, %s1134_s20 }
   0xa   : > { %p267_p1 = scmp.eq.s32.totalorder %s266_s26, 0  ;;  %p280_p2 = scmp.eq.s32.totalorder %s1231_s10, 1 }
   0xb   : > { %p285_p3 = scmp.ne.s32.totalorder %s1134_s20, %s1130_s19  ;;  %p286_p4 = scmp.eq.s32.totalorder %s964_s23, 1 }
   0xc   : > { %s1246_s27 = scalar_select %p267_p1, %s1138_s21, %s269_s25  }
   0xd   : > { %p1248_p5 = por %p280_p2, %p279_p0  ;;  %p1252_p6 = por %p286_p4, %p285_p3 }
   0xe   : > { %p965_p7 = scmp.ge.s32.totalorder %s1142_s22, 1  ;;  %p293_p8 = scmp.lt.s32.totalorder %s1142_s22, 3 }
   0xf   : > { %p1004_p9 = scmp.eq.s32.totalorder %s1231_s10, 0  ;;  %s322_s13 = sshll.u32 %s1498_s7, 4  ;;  %s323_s13 = int_to_ptr.hbm [resolvable:$true] %s322_s13 }
  0x10   : > { %p294_p10 = pnand %p965_p7, %p293_p8  ;;  %s1144_s14 = smov [#allocation3]  }
  0x11   : > { %s324_s15 = sshll.u32 %s1144_s14, 4  ;;  %s1145_s16 = smov 128   ;;  %s325_s15 = int_to_ptr.vmem [resolvable:$true] %s324_s15 }
  0x12   : > { %p996_p11 = pneg %p294_p10  ;;  %s1146_s17 = smov 8  }
  0x13   : > { %358 = sbr.rel (%p294_p10) target bundleno = 879 (0x36f), region = 64 }
  0x14   : > { %p997_p12 = pnand %p1004_p9, %p996_p11 }
  0x16   : > { %999 = dma.hbm_to_vmem [thread:$0]  (!%p997_p12), %s323_s13, 2048, %s325_s15, [#allocation4], %s1145_s16, %s1145_s16, %s1146_s17  }
  0x18   : > { %1121 = dma.done.wait (%p1004_p9), [#allocation4], 2048  }
  0x19   : > { %1123 = vsyncadd (%p1004_p9), [#allocation4], 4294965248  ;;  %s970_s18 = sshll.u32 %s1231_s10, 4  ;;  %s1506_s0 = sld [smem:[#allocation9_spill]]  ;;  %v421_v0 = vld [vmem:[%s1492_s1 + $0x8] sm:$0xff]  ;;  %v420_v1 = vld [vmem:[%s1492_s1] sm:$0xff] }
  0x1a   : > { %p399_p13 = scmp.lt.s32.totalorder %s970_s18, 31  ;;  %489 = vmatpush.msra.mxu0 %v421_v0  ;;  %vm426_vm0 = vcmask 130048   ;;  %v571_v11 = vld [vmem:[%s1494_s3 + $0x78] sm:$0xff]  ;;  %v570_v12 = vld [vmem:[%s1494_s3 + $0x70] sm:$0xff]  ;;  %v569_v13 = vld [vmem:[%s1494_s3 + $0x68] sm:$0xff]  ;;  %s880_s16 = sld [smem:[#allocation2]] }
  0x1b   : > { %576 = vmatpush.msra.mxu1 %v571_v11  ;;  %v568_v15 = vld [vmem:[%s1494_s3 + $0x60] sm:$0xff]  ;;  %v567_v16 = vld [vmem:[%s1494_s3 + $0x58] sm:$0xff]  ;;  %v566_v17 = vld [vmem:[%s1494_s3 + $0x50] sm:$0xff]  ;;  %s396_s17 = sand.u32 1, %s1134_s20  }
  0x1c   : > { %s1512_s18 = smov (!%p399_p13, %s970_s18), 31  ;;  %490 = vmatpush.msra.mxu0 %v420_v1  ;;  %v565_v18 = vld [vmem:[%s1494_s3 + $0x48] sm:$0xff]  ;;  %v564_v20 = vld [vmem:[%s1494_s3 + $0x40] sm:$0xff]  ;;  %v563_v21 = vld [vmem:[%s1494_s3 + $0x38] sm:$0xff]  ;;  %s397_s25 = scalar_lea.vmem [#allocation6], %s396_s17 }
  0x1d   : > { %s971_s23 = sshll.u32 %s1512_s18, 3  ;;  %577 = vmatpush.msra.mxu1 %v570_v12  ;;  %v562_v22 = vld [vmem:[%s1494_s3 + $0x30] sm:$0xff]  ;;  %v561_v23 = vld [vmem:[%s1494_s3 + $0x28] sm:$0xff]  ;;  %v560_v25 = vld [vmem:[%s1494_s3 + $0x20] sm:$0xff]  ;;  %s895_s26 = sshll.u32 %s397_s25, 4  ;;  %s896_s26 = int_to_ptr.vmem [resolvable:$true] %s895_s26 }
  0x1e   : > { %v559_v26 = vld [vmem:[%s1494_s3 + $0x18] sm:$0xff]  ;;  %v558_v27 = vld [vmem:[%s1494_s3 + $0x10] sm:$0xff]  ;;  %v557_v29 = vld [vmem:[%s1494_s3 + $0x8] sm:$0xff]  ;;  %s885_s14 = scalar_lea.sflag [#allocation5], %s396_s17 }
  0x1f   : > { %s1272_s30 = scalar_lea.vmem %s1506_s0, %s971_s23  ;;  %578 = vmatpush.msra.mxu1 %v569_v13  ;;  %v556_v30 = vld [vmem:[%s1494_s3] sm:$0xff]  ;;  %v672_v62 = vld [vmem:[%s1496_s5 + $0x78] sm:$0xff]  ;;  %v671_v1 = vld [vmem:[%s1496_s5 + $0x70] sm:$0xff] }
  0x20   : > { %v404_v2 = vld [vmem:[%s1272_s30] sm:$0xff]  ;;  %v405_v3 = vld [vmem:[%s1272_s30 + $0x8] sm:$0xff]  ;;  %v406_v4 = vld [vmem:[%s1272_s30 + $0x10] sm:$0xff]  ;;  %677 = vmatpush.msra.mxu2 %v672_v62 }
  0x21   : > { %972 = vmatmul.msk.f32.vlgmr.msra.gmra.mxu0 %vm426_vm0, %v404_v2  ;;  %v407_v5 = vld [vmem:[%s1272_s30 + $0x18] sm:$0xff]  ;;  %v408_v6 = vld [vmem:[%s1272_s30 + $0x20] sm:$0xff]  ;;  %v409_v7 = vld [vmem:[%s1272_s30 + $0x28] sm:$0xff]  ;;  %579 = vmatpush.msra.mxu1 %v568_v15 }
  0x22   : > { %v410_v8 = vld [vmem:[%s1272_s30 + $0x30] sm:$0xff]  ;;  %v411_v9 = vld [vmem:[%s1272_s30 + $0x38] sm:$0xff]  ;;  %v412_v10 = vld [vmem:[%s1272_s30 + $0x40] sm:$0xff]  ;;  %678 = vmatpush.msra.mxu2 %v671_v1 }
  0x23   : > { %v413_v14 = vld [vmem:[%s1272_s30 + $0x48] sm:$0xff]  ;;  %580 = vmatpush.msra.mxu1 %v567_v16  ;;  %v414_v19 = vld [vmem:[%s1272_s30 + $0x50] sm:$0xff]  ;;  %v415_v24 = vld [vmem:[%s1272_s30 + $0x58] sm:$0xff] }
  0x24   : > { %v416_v28 = vld [vmem:[%s1272_s30 + $0x60] sm:$0xff]  ;;  %v417_v31 = vld [vmem:[%s1272_s30 + $0x68] sm:$0xff]  ;;  %v418_v32 = vld [vmem:[%s1272_s30 + $0x70] sm:$0xff] }
  0x25   : > { %581 = vmatpush.msra.mxu1 %v566_v17  ;;  %v419_v33 = vld [vmem:[%s1272_s30 + $0x78] sm:$0xff]  ;;  %v1363_v34 = vld [vmem:[%s1493_s2] ss:$0 sm:$0xff]  ;;  %v663_v15 = vld [vmem:[%s1496_s5 + $0x30] sm:$0xff]  ;;  %s893_s30 = scalar_lea.hbm %s1502_s11, %s1231_s10  ;;  %s1096_s10 = scalar_lea.hbm %s1502_s11, 2 }
  0x26   : > { %v665_v11 = vld [vmem:[%s1496_s5 + $0x40] sm:$0xff]  ;;  %v664_v12 = vld [vmem:[%s1496_s5 + $0x38] sm:$0xff]  ;;  %v662_v17 = vld [vmem:[%s1496_s5 + $0x28] sm:$0xff]  ;;  %s897_s12 = sshll.u32 %s893_s30, 4  ;;  %s898_s12 = int_to_ptr.hbm [resolvable:$true] %s897_s12 }
  0x27   : > { %582 = vmatpush.msra.mxu1 %v565_v18  ;;  %v661_v18 = vld [vmem:[%s1496_s5 + $0x20] sm:$0xff]  ;;  %s1090_s13 = sshra.s32 %s898_s12, 4  ;;  %s1091_s13 = int_to_ptr.hbm [resolvable:$true] %s1090_s13 }
  0x28   : > { %s1092_s15 = scalar_lea.hbm %s1091_s13, 1  ;;  %p1097_p3 = scmp.lt.s32.totalorder %s1091_s13, %s1502_s11 }
  0x29   : > { %973 = vmatmul.msk.f32.gmra.mxu0 %vm426_vm0, %v405_v3  ;;  %583 = vmatpush.msra.mxu1 %v564_v20  ;;  %v670_v3 = vld [vmem:[%s1496_s5 + $0x68] sm:$0xff]  ;;  %p1093_p0 = scmp.ne.s32.totalorder %s1091_s13, %s1092_s15  ;;  %p1098_p4 = scmp.lt.s32.totalorder %s1096_s10, %s1092_s15 }
  0x2a   : > { %679 = vmatpush.msra.mxu2 %v670_v3  ;;  %v772_v3 = vld [vmem:[#allocation3 + $0x70] sm:$0xff] }
  0x2b   : > { %584 = vmatpush.msra.mxu1 %v563_v21  ;;  %p1094_p1 = pnand %p1093_p0, %p1248_p5  ;;  %p1099_p7 = por %p1098_p4, %p1097_p3 }
  0x2d   : > { %585 = vmatpush.msra.mxu1 %v562_v22  ;;  %v659_v22 = vld [vmem:[%s1496_s5 + $0x10] sm:$0xff]  ;;  %p1095_p2 = pneg %p1094_p1 }
  0x2f   : > { %586 = vmatpush.msra.mxu1 %v561_v23  ;;  %p1100_p8 = pnand %p1099_p7, %p1095_p2 }
  0x31   : > { %974 = vmatmul.msk.f32.gmra.mxu0 %vm426_vm0, %v406_v4  ;;  %587 = vmatpush.msra.mxu1 %v560_v25  ;;  %v669_v4 = vld [vmem:[%s1496_s5 + $0x60] sm:$0xff] }
  0x32   : > { %680 = vmatpush.msra.mxu2 %v669_v4  ;;  %v657_v25 = vld [vmem:[%s1496_s5] sm:$0xff] }
  0x33   : > { %588 = vmatpush.msra.mxu1 %v559_v26 }
  0x35   : > { %589 = vmatpush.msra.mxu1 %v558_v27 }
  0x37   : > { %590 = vmatpush.msra.mxu1 %v557_v29 }
  0x39   : > { %975 = vmatmul.msk.f32.gmra.mxu0 %vm426_vm0, %v407_v5  ;;  %591 = vmatpush.msra.mxu1 %v556_v30  ;;  %v668_v5 = vld [vmem:[%s1496_s5 + $0x58] sm:$0xff] }
  0x3a   : > { %681 = vmatpush.msra.mxu2 %v668_v5 }
  0x41   : > { %976 = vmatmul.msk.f32.gmra.mxu0 %vm426_vm0, %v408_v6 }
  0x49   : > { %977 = vmatmul.msk.f32.gmra.mxu0 %vm426_vm0, %v409_v7 }
  0x51   : > { %978 = vmatmul.msk.f32.gmra.mxu0 %vm426_vm0, %v410_v8  ;;  %v667_v8 = vld [vmem:[%s1496_s5 + $0x50] sm:$0xff] }
  0x52   : > { %682 = vmatpush.msra.mxu2 %v667_v8  ;;  %v770_v8 = vld [vmem:[#allocation3 + $0x60] sm:$0xff] }
  0x59   : > { %979 = vmatmul.msk.f32.gmra.mxu0 %vm426_vm0, %v411_v9 }
  0x61   : > { %980 = vmatmul.msk.f32.gmra.mxu0 %vm426_vm0, %v412_v10  ;;  %v666_v10 = vld [vmem:[%s1496_s5 + $0x48] sm:$0xff] }
  0x62   : > { %683 = vmatpush.msra.mxu2 %v666_v10  ;;  %v768_v10 = vld [vmem:[#allocation3 + $0x50] sm:$0xff] }
  0x64   : > { %684 = vmatpush.msra.mxu2 %v665_v11 }
  0x66   : > { %685 = vmatpush.msra.mxu2 %v664_v12 }
  0x68   : > { %686 = vmatpush.msra.mxu2 %v663_v15  ;;  %v766_v15 = vld [vmem:[#allocation3 + $0x40] sm:$0xff] }
  0x69   : > { %981 = vmatmul.msk.f32.gmra.mxu0 %vm426_vm0, %v413_v14 }
  0x6a   : > { %687 = vmatpush.msra.mxu2 %v662_v17  ;;  %v764_v17 = vld [vmem:[#allocation3 + $0x30] sm:$0xff] }
  0x6c   : > { %688 = vmatpush.msra.mxu2 %v661_v18  ;;  %v763_v18 = vld [vmem:[#allocation3 + $0x28] sm:$0xff] }
  0x71   : > { %982 = vmatmul.msk.f32.gmra.mxu0 %vm426_vm0, %v414_v19  ;;  %v660_v19 = vld [vmem:[%s1496_s5 + $0x18] sm:$0xff] }
  0x72   : > { %689 = vmatpush.msra.mxu2 %v660_v19 }
  0x74   : > { %690 = vmatpush.msra.mxu2 %v659_v22 }
  0x79   : > { %983 = vmatmul.msk.f32.gmra.mxu0 %vm426_vm0, %v415_v24  ;;  %v658_v24 = vld [vmem:[%s1496_s5 + $0x8] sm:$0xff] }
  0x7a   : > { %691 = vmatpush.msra.mxu2 %v658_v24  ;;  %v760_v24 = vld [vmem:[#allocation3 + $0x10] sm:$0xff] }
  0x7c   : > { %692 = vmatpush.msra.mxu2 %v657_v25 }
  0x81   : > { %984 = vmatmul.msk.f32.gmra.mxu0 %vm426_vm0, %v416_v28 }
  0x89   : > { %985 = vmatmul.msk.f32.gmra.mxu0 %vm426_vm0, %v417_v31 }
  0x91   : > { %986 = vmatmul.msk.f32.gmra.mxu0 %vm426_vm0, %v418_v32 }
  0x99   : > { %987 = vmatmul.msk.f32.gmra.mxu0 %vm426_vm0, %v419_v33 }
  0x9e   : > { %v492_v35 = vpop.f32.mrf.mxu0 }
  0x9f   : > { %v493_v36 = vadd.f32 %v1363_v34, %v492_v35 }
  0xa1   : > { %v540_v37 = vmax.f32 %v493_v36, 0.0  ;;  %v1432_v36 = vld [vmem:[%s1495_s4] ss:$0 sm:$0xff] }
  0xa3   : > { %592 = vmatmul.f32.vlgmr.msra.gmra.mxu1 %v540_v37 }
  0xa6   : > { %v495_v38 = vpop.f32.mrf.mxu0 }
  0xa7   : > { %v496_v39 = vadd.f32 %v1363_v34, %v495_v38 }
  0xa9   : > { %v541_v40 = vmax.f32 %v496_v39, 0.0 }
  0xab   : > { %595 = vmatmul.f32.gmra.mxu1 %v541_v40 }
  0xae   : > { %v498_v41 = vpop.f32.mrf.mxu0 }
  0xaf   : > { %v499_v42 = vadd.f32 %v1363_v34, %v498_v41 }
  0xb1   : > { %v542_v43 = vmax.f32 %v499_v42, 0.0 }
  0xb3   : > { %598 = vmatmul.f32.gmra.mxu1 %v542_v43 }
  0xb6   : > { %v501_v44 = vpop.f32.mrf.mxu0 }
  0xb7   : > { %v502_v45 = vadd.f32 %v1363_v34, %v501_v44 }
  0xb9   : > { %v543_v46 = vmax.f32 %v502_v45, 0.0 }
  0xbb   : > { %601 = vmatmul.f32.gmra.mxu1 %v543_v46 }
  0xbe   : > { %v504_v47 = vpop.f32.mrf.mxu0 }
  0xbf   : > { %v505_v48 = vadd.f32 %v1363_v34, %v504_v47 }
  0xc1   : > { %v544_v49 = vmax.f32 %v505_v48, 0.0 }
  0xc3   : > { %604 = vmatmul.f32.gmra.mxu1 %v544_v49 }
  0xc6   : > { %v507_v50 = vpop.f32.mrf.mxu0 }
  0xc7   : > { %v508_v51 = vadd.f32 %v1363_v34, %v507_v50 }
  0xc9   : > { %v545_v52 = vmax.f32 %v508_v51, 0.0 }
  0xcb   : > { %607 = vmatmul.f32.gmra.mxu1 %v545_v52 }
  0xce   : > { %v510_v53 = vpop.f32.mrf.mxu0 }
  0xcf   : > { %v511_v54 = vadd.f32 %v1363_v34, %v510_v53 }
  0xd1   : > { %v546_v55 = vmax.f32 %v511_v54, 0.0 }
  0xd3   : > { %610 = vmatmul.f32.gmra.mxu1 %v546_v55 }
  0xd6   : > { %v513_v56 = vpop.f32.mrf.mxu0 }
  0xd7   : > { %v514_v57 = vadd.f32 %v1363_v34, %v513_v56 }
  0xd9   : > { %v547_v58 = vmax.f32 %v514_v57, 0.0 }
  0xdb   : > { %613 = vmatmul.f32.gmra.mxu1 %v547_v58 }
  0xde   : > { %v516_v59 = vpop.f32.mrf.mxu0 }
  0xdf   : > { %v517_v60 = vadd.f32 %v1363_v34, %v516_v59 }
  0xe1   : > { %v548_v61 = vmax.f32 %v517_v60, 0.0 }
  0xe3   : > { %616 = vmatmul.f32.gmra.mxu1 %v548_v61 }
  0xe6   : > { %v519_v63 = vpop.f32.mrf.mxu0 }
  0xe7   : > { %v520_v0 = vadd.f32 %v1363_v34, %v519_v63 }
  0xe9   : > { %v549_v2 = vmax.f32 %v520_v0, 0.0 }
  0xeb   : > { %619 = vmatmul.f32.gmra.mxu1 %v549_v2  ;;  %v773_v2 = vld [vmem:[#allocation3 + $0x78] sm:$0xff] }
  0xec   : > { %778 = vmatpush.msra.mxu3 %v773_v2 }
  0xee   : > { %v522_v6 = vpop.f32.mrf.mxu0  ;;  %779 = vmatpush.msra.mxu3 %v772_v3 }
  0xef   : > { %v523_v7 = vadd.f32 %v1363_v34, %v522_v6  ;;  %v771_v6 = vld [vmem:[#allocation3 + $0x68] sm:$0xff] }
  0xf0   : > { %780 = vmatpush.msra.mxu3 %v771_v6 }
  0xf1   : > { %v550_v9 = vmax.f32 %v523_v7, 0.0 }
  0xf2   : > { %781 = vmatpush.msra.mxu3 %v770_v8 }
  0xf3   : > { %622 = vmatmul.f32.gmra.mxu1 %v550_v9  ;;  %v769_v9 = vld [vmem:[#allocation3 + $0x58] sm:$0xff] }
  0xf4   : > { %782 = vmatpush.msra.mxu3 %v769_v9 }
  0xf6   : > { %v525_v13 = vpop.f32.mrf.mxu0  ;;  %783 = vmatpush.msra.mxu3 %v768_v10 }
  0xf7   : > { %v526_v14 = vadd.f32 %v1363_v34, %v525_v13  ;;  %v767_v13 = vld [vmem:[#allocation3 + $0x48] sm:$0xff] }
  0xf8   : > { %784 = vmatpush.msra.mxu3 %v767_v13 }
  0xf9   : > { %v551_v16 = vmax.f32 %v526_v14, 0.0 }
  0xfa   : > { %785 = vmatpush.msra.mxu3 %v766_v15 }
  0xfb   : > { %625 = vmatmul.f32.gmra.mxu1 %v551_v16  ;;  %v765_v16 = vld [vmem:[#allocation3 + $0x38] sm:$0xff] }
  0xfc   : > { %786 = vmatpush.msra.mxu3 %v765_v16 }
  0xfe   : > { %v528_v20 = vpop.f32.mrf.mxu0  ;;  %787 = vmatpush.msra.mxu3 %v764_v17 }
  0xff   : > { %v529_v21 = vadd.f32 %v1363_v34, %v528_v20 }
 0x100   : > { %788 = vmatpush.msra.mxu3 %v763_v18 }
 0x101   : > { %v552_v23 = vmax.f32 %v529_v21, 0.0  ;;  %v762_v21 = vld [vmem:[#allocation3 + $0x20] sm:$0xff] }
 0x102   : > { %789 = vmatpush.msra.mxu3 %v762_v21 }
 0x103   : > { %628 = vmatmul.f32.gmra.mxu1 %v552_v23  ;;  %v761_v23 = vld [vmem:[#allocation3 + $0x18] sm:$0xff] }
 0x104   : > { %790 = vmatpush.msra.mxu3 %v761_v23 }
 0x106   : > { %v531_v26 = vpop.f32.mrf.mxu0  ;;  %791 = vmatpush.msra.mxu3 %v760_v24 }
 0x107   : > { %v532_v27 = vadd.f32 %v1363_v34, %v531_v26 }
 0x109   : > { %v553_v28 = vmax.f32 %v532_v27, 0.0  ;;  %v759_v27 = vld [vmem:[#allocation3 + $0x8] sm:$0xff] }
 0x10a   : > { %792 = vmatpush.msra.mxu3 %v759_v27 }
 0x10b   : > { %631 = vmatmul.f32.gmra.mxu1 %v553_v28 }
 0x10e   : > { %v534_v29 = vpop.f32.mrf.mxu0 }
 0x10f   : > { %v535_v30 = vadd.f32 %v1363_v34, %v534_v29  ;;  %v758_v29 = vld [vmem:[#allocation3] sm:$0xff] }
 0x110   : > { %793 = vmatpush.msra.mxu3 %v758_v29 }
 0x111   : > { %v554_v31 = vmax.f32 %v535_v30, 0.0 }
 0x113   : > { %634 = vmatmul.f32.gmra.mxu1 %v554_v31 }
 0x116   : > { %v537_v32 = vpop.f32.mrf.mxu0 }
 0x117   : > { %v538_v33 = vadd.f32 %v1363_v34, %v537_v32 }
 0x119   : > { %v555_v35 = vmax.f32 %v538_v33, 0.0 }
 0x11b   : > { %637 = vmatmul.f32.gmra.mxu1 %v555_v35 }
 0x120   : > { %v593_v37 = vpop.f32.mrf.mxu1 }
 0x121   : > { %v594_v38 = vadd.f32 %v1432_v36, %v593_v37 }
 0x123   : > { %v641_v39 = vmax.f32 %v594_v38, 0.0  ;;  %v1044_v38 = vld [vmem:[%s1497_s6] ss:$0 sm:$0xff] }
 0x125   : > { %693 = vmatmul.f32.vlgmr.msra.gmra.mxu2 %v641_v39 }
 0x128   : > { %v596_v40 = vpop.f32.mrf.mxu1 }
 0x129   : > { %v597_v41 = vadd.f32 %v1432_v36, %v596_v40 }
 0x12b   : > { %v642_v42 = vmax.f32 %v597_v41, 0.0 }
 0x12d   : > { %696 = vmatmul.f32.gmra.mxu2 %v642_v42 }
 0x130   : > { %v599_v43 = vpop.f32.mrf.mxu1 }
 0x131   : > { %v600_v34 = vadd.f32 %v1432_v36, %v599_v43 }
 0x133   : > { %v643_v44 = vmax.f32 %v600_v34, 0.0 }
 0x135   : > { %699 = vmatmul.f32.gmra.mxu2 %v643_v44 }
 0x138   : > { %v602_v45 = vpop.f32.mrf.mxu1 }
 0x139   : > { %v603_v46 = vadd.f32 %v1432_v36, %v602_v45 }
 0x13b   : > { %v644_v47 = vmax.f32 %v603_v46, 0.0 }
 0x13d   : > { %702 = vmatmul.f32.gmra.mxu2 %v644_v47 }
 0x140   : > { %v605_v48 = vpop.f32.mrf.mxu1 }
 0x141   : > { %v606_v49 = vadd.f32 %v1432_v36, %v605_v48 }
 0x143   : > { %v645_v50 = vmax.f32 %v606_v49, 0.0 }
 0x145   : > { %705 = vmatmul.f32.gmra.mxu2 %v645_v50 }
 0x148   : > { %v608_v51 = vpop.f32.mrf.mxu1 }
 0x149   : > { %v609_v52 = vadd.f32 %v1432_v36, %v608_v51 }
 0x14b   : > { %v646_v53 = vmax.f32 %v609_v52, 0.0 }
 0x14d   : > { %708 = vmatmul.f32.gmra.mxu2 %v646_v53 }
 0x150   : > { %v611_v54 = vpop.f32.mrf.mxu1 }
 0x151   : > { %v612_v55 = vadd.f32 %v1432_v36, %v611_v54 }
 0x153   : > { %v647_v56 = vmax.f32 %v612_v55, 0.0 }
 0x155   : > { %711 = vmatmul.f32.gmra.mxu2 %v647_v56 }
 0x158   : > { %v614_v57 = vpop.f32.mrf.mxu1 }
 0x159   : > { %v615_v58 = vadd.f32 %v1432_v36, %v614_v57 }
 0x15b   : > { %v648_v59 = vmax.f32 %v615_v58, 0.0 }
 0x15d   : > { %714 = vmatmul.f32.gmra.mxu2 %v648_v59 }
 0x160   : > { %v617_v60 = vpop.f32.mrf.mxu1 }
 0x161   : > { %v618_v61 = vadd.f32 %v1432_v36, %v617_v60 }
 0x163   : > { %v649_v62 = vmax.f32 %v618_v61, 0.0 }
 0x165   : > { %717 = vmatmul.f32.gmra.mxu2 %v649_v62 }
 0x168   : > { %v620_v63 = vpop.f32.mrf.mxu1 }
 0x169   : > { %v621_v0 = vadd.f32 %v1432_v36, %v620_v63 }
 0x16b   : > { %v650_v1 = vmax.f32 %v621_v0, 0.0 }
 0x16d   : > { %720 = vmatmul.f32.gmra.mxu2 %v650_v1 }
 0x170   : > { %v623_v4 = vpop.f32.mrf.mxu1 }
 0x171   : > { %v624_v5 = vadd.f32 %v1432_v36, %v623_v4 }
 0x173   : > { %v651_v7 = vmax.f32 %v624_v5, 0.0 }
 0x175   : > { %723 = vmatmul.f32.gmra.mxu2 %v651_v7 }
 0x178   : > { %v626_v11 = vpop.f32.mrf.mxu1 }
 0x179   : > { %v627_v12 = vadd.f32 %v1432_v36, %v626_v11 }
 0x17b   : > { %v652_v14 = vmax.f32 %v627_v12, 0.0 }
 0x17d   : > { %726 = vmatmul.f32.gmra.mxu2 %v652_v14 }
 0x180   : > { %v629_v19 = vpop.f32.mrf.mxu1 }
 0x181   : > { %v630_v20 = vadd.f32 %v1432_v36, %v629_v19 }
 0x183   : > { %v653_v22 = vmax.f32 %v630_v20, 0.0 }
 0x185   : > { %729 = vmatmul.f32.gmra.mxu2 %v653_v22 }
 0x188   : > { %v632_v25 = vpop.f32.mrf.mxu1 }
 0x189   : > { %v633_v26 = vadd.f32 %v1432_v36, %v632_v25 }
 0x18b   : > { %v654_v28 = vmax.f32 %v633_v26, 0.0 }
 0x18d   : > { %732 = vmatmul.f32.gmra.mxu2 %v654_v28 }
 0x190   : > { %v635_v30 = vpop.f32.mrf.mxu1 }
 0x191   : > { %v636_v31 = vadd.f32 %v1432_v36, %v635_v30 }
 0x193   : > { %v655_v32 = vmax.f32 %v636_v31, 0.0 }
 0x195   : > { %735 = vmatmul.f32.gmra.mxu2 %v655_v32 }
 0x198   : > { %v638_v33 = vpop.f32.mrf.mxu1 }
 0x199   : > { %v639_v35 = vadd.f32 %v1432_v36, %v638_v33 }
 0x19b   : > { %v656_v37 = vmax.f32 %v639_v35, 0.0 }
 0x19d   : > { %738 = vmatmul.f32.gmra.mxu2 %v656_v37 }
 0x1a8   : > { %v694_v39 = vpop.f32.mrf.mxu2 }
 0x1a9   : > { %v695_v40 = vadd.f32 %v1044_v38, %v694_v39 }
 0x1ab   : > { %v742_v41 = vmax.f32 %v695_v40, 0.0 }
 0x1ad   : > { %794 = vmatmul.f32.vlgmr.msra.gmra.mxu3 %v742_v41 }
 0x1b0   : > { %v697_v42 = vpop.f32.mrf.mxu2 }
 0x1b1   : > { %v698_v43 = vadd.f32 %v1044_v38, %v697_v42 }
 0x1b3   : > { %v743_v34 = vmax.f32 %v698_v43, 0.0 }
 0x1b5   : > { %797 = vmatmul.f32.gmra.mxu3 %v743_v34 }
 0x1b8   : > { %v700_v44 = vpop.f32.mrf.mxu2 }
 0x1b9   : > { %v701_v45 = vadd.f32 %v1044_v38, %v700_v44 }
 0x1bb   : > { %v744_v46 = vmax.f32 %v701_v45, 0.0 }
 0x1bd   : > { %800 = vmatmul.f32.gmra.mxu3 %v744_v46 }
 0x1c0   : > { %v703_v47 = vpop.f32.mrf.mxu2 }
 0x1c1   : > { %v704_v36 = vadd.f32 %v1044_v38, %v703_v47 }
 0x1c3   : > { %v745_v48 = vmax.f32 %v704_v36, 0.0 }
 0x1c5   : > { %803 = vmatmul.f32.gmra.mxu3 %v745_v48 }
 0x1c8   : > { %v706_v49 = vpop.f32.mrf.mxu2 }
 0x1c9   : > { %v707_v50 = vadd.f32 %v1044_v38, %v706_v49 }
 0x1cb   : > { %v746_v51 = vmax.f32 %v707_v50, 0.0 }
 0x1cd   : > { %806 = vmatmul.f32.gmra.mxu3 %v746_v51 }
 0x1d0   : > { %v709_v52 = vpop.f32.mrf.mxu2 }
 0x1d1   : > { %v710_v53 = vadd.f32 %v1044_v38, %v709_v52 }
 0x1d3   : > { %v747_v54 = vmax.f32 %v710_v53, 0.0 }
 0x1d5   : > { %809 = vmatmul.f32.gmra.mxu3 %v747_v54 }
 0x1d8   : > { %v712_v55 = vpop.f32.mrf.mxu2 }
 0x1d9   : > { %v713_v56 = vadd.f32 %v1044_v38, %v712_v55 }
 0x1db   : > { %v748_v57 = vmax.f32 %v713_v56, 0.0 }
 0x1dd   : > { %812 = vmatmul.f32.gmra.mxu3 %v748_v57 }
 0x1e0   : > { %v715_v58 = vpop.f32.mrf.mxu2 }
 0x1e1   : > { %v716_v59 = vadd.f32 %v1044_v38, %v715_v58 }
 0x1e3   : > { %v749_v60 = vmax.f32 %v716_v59, 0.0 }
 0x1e5   : > { %815 = vmatmul.f32.gmra.mxu3 %v749_v60 }
 0x1e8   : > { %v718_v61 = vpop.f32.mrf.mxu2 }
 0x1e9   : > { %v719_v62 = vadd.f32 %v1044_v38, %v718_v61 }
 0x1eb   : > { %v750_v63 = vmax.f32 %v719_v62, 0.0 }
 0x1ed   : > { %818 = vmatmul.f32.gmra.mxu3 %v750_v63 }
 0x1f0   : > { %v721_v0 = vpop.f32.mrf.mxu2 }
 0x1f1   : > { %v722_v1 = vadd.f32 %v1044_v38, %v721_v0 }
 0x1f3   : > { %v751_v2 = vmax.f32 %v722_v1, 0.0 }
 0x1f5   : > { %821 = vmatmul.f32.gmra.mxu3 %v751_v2 }
 0x1f8   : > { %v724_v3 = vpop.f32.mrf.mxu2 }
 0x1f9   : > { %v725_v4 = vadd.f32 %v1044_v38, %v724_v3 }
 0x1fb   : > { %v752_v5 = vmax.f32 %v725_v4, 0.0 }
 0x1fd   : > { %824 = vmatmul.f32.gmra.mxu3 %v752_v5 }
 0x200   : > { %v727_v6 = vpop.f32.mrf.mxu2 }
 0x201   : > { %v728_v7 = vadd.f32 %v1044_v38, %v727_v6  ;;  %v859_v6 = vld [vmem:[%s1500_s9] sm:$0xff] }
 0x203   : > { %v753_v8 = vmax.f32 %v728_v7, 0.0  ;;  %v881_v7 = vstv %s880_s16 }
 0x205   : > { %827 = vmatmul.f32.gmra.mxu3 %v753_v8 }
 0x208   : > { %v730_v9 = vpop.f32.mrf.mxu2 }
 0x209   : > { %v731_v10 = vadd.f32 %v1044_v38, %v730_v9 }
 0x20b   : > { %v754_v11 = vmax.f32 %v731_v10, 0.0 }
 0x20d   : > { %830 = vmatmul.f32.gmra.mxu3 %v754_v11 }
 0x210   : > { %v733_v12 = vpop.f32.mrf.mxu2 }
 0x211   : > { %v734_v13 = vadd.f32 %v1044_v38, %v733_v12 }
 0x213   : > { %v755_v14 = vmax.f32 %v734_v13, 0.0 }
 0x215   : > { %833 = vmatmul.f32.gmra.mxu3 %v755_v14 }
 0x218   : > { %v736_v15 = vpop.f32.mrf.mxu2 }
 0x219   : > { %v737_v16 = vadd.f32 %v1044_v38, %v736_v15 }
 0x21b   : > { %v756_v17 = vmax.f32 %v737_v16, 0.0 }
 0x21d   : > { %836 = vmatmul.f32.gmra.mxu3 %v756_v17 }
 0x220   : > { %v739_v18 = vpop.f32.mrf.mxu2 }
 0x221   : > { %v740_v19 = vadd.f32 %v1044_v38, %v739_v18  ;;  %v1045_v38 = vld [vmem:[%s1499_s8] ss:$0 sm:$0xff] }
 0x223   : > { %v757_v20 = vmax.f32 %v740_v19, 0.0 }
 0x225   : > { %839 = vmatmul.f32.gmra.mxu3 %v757_v20 }
 0x230   : > { %v795_v21 = vpop.f32.mrf.mxu3 }
 0x231   : > { %v796_v3 = vadd.f32 %v1045_v38, %v795_v21 }
 0x233   : > { %v843_v5 = vmax.f32 %v796_v3, 0.0 }
 0x238   : > { %v798_v22 = vpop.f32.mrf.mxu3 }
 0x239   : > { %v799_v1 = vadd.f32 %v1045_v38, %v798_v22 }
 0x23b   : > { %v844_v4 = vmax.f32 %v799_v1, 0.0 }
 0x240   : > { %v801_v23 = vpop.f32.mrf.mxu3 }
 0x241   : > { %v802_v63 = vadd.f32 %v1045_v38, %v801_v23 }
 0x243   : > { %v845_v2 = vmax.f32 %v802_v63, 0.0 }
 0x248   : > { %v804_v24 = vpop.f32.mrf.mxu3 }
 0x249   : > { %v805_v61 = vadd.f32 %v1045_v38, %v804_v24 }
 0x24b   : > { %v846_v0 = vmax.f32 %v805_v61, 0.0 }
 0x250   : > { %v807_v25 = vpop.f32.mrf.mxu3 }
 0x251   : > { %v808_v59 = vadd.f32 %v1045_v38, %v807_v25 }
 0x253   : > { %v847_v62 = vmax.f32 %v808_v59, 0.0 }
 0x258   : > { %v810_v26 = vpop.f32.mrf.mxu3 }
 0x259   : > { %v811_v57 = vadd.f32 %v1045_v38, %v810_v26 }
 0x25b   : > { %v848_v60 = vmax.f32 %v811_v57, 0.0 }
 0x260   : > { %v813_v27 = vpop.f32.mrf.mxu3 }
 0x261   : > { %v814_v55 = vadd.f32 %v1045_v38, %v813_v27 }
 0x263   : > { %v849_v58 = vmax.f32 %v814_v55, 0.0 }
 0x268   : > { %v816_v28 = vpop.f32.mrf.mxu3 }
 0x269   : > { %v817_v53 = vadd.f32 %v1045_v38, %v816_v28 }
 0x26b   : > { %v850_v56 = vmax.f32 %v817_v53, 0.0 }
 0x270   : > { %v819_v29 = vpop.f32.mrf.mxu3 }
 0x271   : > { %v820_v51 = vadd.f32 %v1045_v38, %v819_v29 }
 0x273   : > { %v851_v54 = vmax.f32 %v820_v51, 0.0 }
 0x278   : > { %v822_v30 = vpop.f32.mrf.mxu3 }
 0x279   : > { %v823_v49 = vadd.f32 %v1045_v38, %v822_v30 }
 0x27b   : > { %v852_v52 = vmax.f32 %v823_v49, 0.0 }
 0x280   : > { %v825_v31 = vpop.f32.mrf.mxu3 }
 0x281   : > { %v826_v36 = vadd.f32 %v1045_v38, %v825_v31 }
 0x283   : > { %v853_v50 = vmax.f32 %v826_v36, 0.0 }
 0x288   : > { %v828_v32 = vpop.f32.mrf.mxu3 }
 0x289   : > { %v829_v46 = vadd.f32 %v1045_v38, %v828_v32 }
 0x28b   : > { %v854_v48 = vmax.f32 %v829_v46, 0.0 }
 0x290   : > { %v831_v33 = vpop.f32.mrf.mxu3 }
 0x291   : > { %v832_v44 = vadd.f32 %v1045_v38, %v831_v33 }
 0x293   : > { %v855_v47 = vmax.f32 %v832_v44, 0.0 }
 0x298   : > { %v834_v35 = vpop.f32.mrf.mxu3 }
 0x299   : > { %v835_v43 = vadd.f32 %v1045_v38, %v834_v35 }
 0x29b   : > { %v856_v45 = vmax.f32 %v835_v43, 0.0 }
 0x2a0   : > { %v837_v37 = vpop.f32.mrf.mxu3 }
 0x2a1   : > { %v838_v41 = vadd.f32 %v1045_v38, %v837_v37 }
 0x2a3   : > { %v857_v34 = vmax.f32 %v838_v41, 0.0 }
 0x2a8   : > { %v840_v39 = vpop.f32.mrf.mxu3 }
 0x2a9   : > { %v841_v40 = vadd.f32 %v1045_v38, %v840_v39 }
 0x2ab   : > { %v858_v42 = vmax.f32 %v841_v40, 0.0 }
 0x2ad   : > { %860 = vmatpush.xpose.msrb.mxu0 %v858_v42 }
 0x2b1   : > { %861 = vmatpush.xpose.msrb.mxu0 %v857_v34 }
 0x2b5   : > { %862 = vmatpush.xpose.msrb.mxu0 %v856_v45 }
 0x2b9   : > { %863 = vmatpush.xpose.msrb.mxu0 %v855_v47 }
 0x2bd   : > { %864 = vmatpush.xpose.msrb.mxu0 %v854_v48 }
 0x2c1   : > { %865 = vmatpush.xpose.msrb.mxu0 %v853_v50 }
 0x2c5   : > { %866 = vmatpush.xpose.msrb.mxu0 %v852_v52 }
 0x2c9   : > { %867 = vmatpush.xpose.msrb.mxu0 %v851_v54 }
 0x2cd   : > { %868 = vmatpush.xpose.msrb.mxu0 %v850_v56 }
 0x2d1   : > { %869 = vmatpush.xpose.msrb.mxu0 %v849_v58 }
 0x2d5   : > { %870 = vmatpush.xpose.msrb.mxu0 %v848_v60 }
 0x2d9   : > { %871 = vmatpush.xpose.msrb.mxu0 %v847_v62 }
 0x2dd   : > { %872 = vmatpush.xpose.msrb.mxu0 %v846_v0 }
 0x2e1   : > { %873 = vmatpush.xpose.msrb.mxu0 %v845_v2 }
 0x2e5   : > { %874 = vmatpush.xpose.msrb.mxu0 %v844_v4 }
 0x2e9   : > { %875 = vmatpush.xpose.msrb.mxu0 %v843_v5 }
 0x2ec   : > { %876 = vmatmul.f32.vlgmr.msrb.gmra.mxu0 %v859_v6 }
 0x369   : > { %v877_v8 = vpop.f32.mrf.mxu0 }
 0x36a   : > { %v882_v9 = vadd.f32 %v881_v7, %v877_v8 }
 0x36c   : > { %883 = vst [vmem:[%s397_s25] sm:$0x1] %v882_v9 }
 0x36d   : > { %1103 = shalt.err (!%p1100_p8)
}
 0x36e   : > { %994 = dma.vmem_to_hbm [thread:$0]  (%p1248_p5), %s896_s26, 16, %s898_s12, %s885_s14  }
 0x36f PF: > { %p1006_p9 = scmp.ge.s32.totalorder %s1142_s22, 2  ;;  %s909_s17 = sand.u32 1, %s1130_s19  }
 0x370   : > { %s910_s30 = scalar_lea.sflag [#allocation5], %s909_s17 }
 0x371   : > { %p1001_p10 = pnand %p1006_p9, %p1252_p6 }
 0x373   : > { %p1002_p11 = pneg %p1001_p10 }
 0x375   : > { %1125 = dma.done.wait (%p1002_p11), %s910_s30, 16  }
 0x376   : > { %1127 = vsyncadd (%p1002_p11), %s910_s30, 4294967280  ;;  %p23_p12 = scmp.ge.s32.totalorder %s1235_s24, 4   ;;  %s1507_s19 = smov %s1134_s20 }
 0x377   : > { %s1508_s20 = smov %s1138_s21  ;;  %s1509_s21 = smov %s1246_s27 }
 0x378   : > { %s1510_s22 = smov %s1235_s24  ;;  %25 = sbr.rel (!%p23_p12) target bundleno = 7 (0x7), region = 104 }
 0x37d   :  { %915 = vsyncpa [#allocation4], 1 }
 0x37e   :  { %917 = vsyncpa [#allocation4 + $0x1], 1 }
 0x37f   :  { %918 = vsyncpa [#allocation5], 1 }
 0x380   :  { %920 = vsyncpa [#allocation5 + $0x1], 1 }

</bundles_post_ra>
